<compile_context>
chip_gen: v5e
topology: v5e:2x2
jax: 0.10.0
libtpu: 0.0.40
codegen_flags: <defaults>
</compile_context>

<pallas_src>
import functools

import jax
import jax.numpy as jnp
from jax import lax
from jax.experimental import pallas as pl
from jax.experimental.pallas import tpu as pltpu


# --------------------------------------------------------------------------- #
# Kernel bodies
# --------------------------------------------------------------------------- #
def _sdpa_body(q_ref, kT_ref, v_ref, keep_ref, out_ref, attn_ref, inv_scale):
    # q_ref: (Tq, d_k), kT_ref: (d_k, L), v_ref: (L, d_k), keep_ref: (Tq, L) int8 or None.
    q = q_ref[...]
    kT = kT_ref[...]
    v = v_ref[...]

    # scores = (q @ k^T) / scale, accumulated and scaled in f32 (matches the
    # torch reference which divides f32 scores; no extra bf16 rounding of q).
    scores = lax.dot_general(
        q, kT, (((1,), (0,)), ((), ())), preferred_element_type=jnp.float32
    )
    scores = scores * jnp.float32(inv_scale)

    if keep_ref is not None:
        # masked_fill(mask == 0, -1e9): keep flag is int8 (1 = keep, 0 = mask).
        scores = jnp.where(keep_ref[...] != 0, scores, jnp.float32(-1000000000.0))

    # Numerically stable softmax over the key axis (f32 throughout).
    m = jnp.max(scores, axis=-1, keepdims=True)
    e = jnp.exp(scores - m)
    denom = jnp.sum(e, axis=-1, keepdims=True)
    # Exact reciprocal to preserve softmax accuracy vs. torch.
    attn = e * pl.reciprocal(denom, approx=False)

    # output = attn @ v; probabilities cast to v's dtype for full MXU rate.
    out = lax.dot_general(
        attn.astype(v.dtype), v, (((1,), (0,)), ((), ())),
        preferred_element_type=jnp.float32,
    )

    out_ref[...] = out.astype(out_ref.dtype)
    attn_ref[...] = attn.astype(attn_ref.dtype)


def _sdpa_kernel_mask(q_ref, kT_ref, v_ref, keep_ref, out_ref, attn_ref, *, inv_scale):
    _sdpa_body(q_ref, kT_ref, v_ref, keep_ref, out_ref, attn_ref, inv_scale)


def _sdpa_kernel_nomask(q_ref, kT_ref, v_ref, out_ref, attn_ref, *, inv_scale):
    _sdpa_body(q_ref, kT_ref, v_ref, None, out_ref, attn_ref, inv_scale)


# --------------------------------------------------------------------------- #
# VMEM-aware tiling
# --------------------------------------------------------------------------- #
def _vmem_capacity_bytes():
    """Physical per-core VMEM; conservative 64 MiB (v7x) if the query fails."""
    try:
        info = pltpu.get_tpu_info()
        cap = getattr(info, "vmem_capacity_bytes", None)
        if cap:
            return int(cap)
    except Exception:
        pass
    return 64 * 1024 * 1024


def _pick_q_tile(L, d_k, in_bytes, attn_bytes, has_mask, vmem_budget):
    """Largest q-row tile whose double-buffered blocks + f32 temps fit the budget."""
    dk_lane = pl.cdiv(d_k, 128) * 128  # lane padding of d_k-minor tiles

    # Fixed per-step cost (independent of Tq): double-buffered K^T and V blocks.
    fixed = 2 * d_k * L * in_bytes + 2 * L * dk_lane * in_bytes

    # Per-q-row cost: double-buffered q / out / attn / mask blocks + f32 temps.
    per_row = (
        2 * dk_lane * in_bytes       # q block
        + 2 * dk_lane * in_bytes     # out block
        + 2 * L * attn_bytes         # attn output block
        + (2 * L if has_mask else 0) # int8 keep block
        + 4 * L * 4                  # f32 scores / exp / attn temporaries
    )

    max_rows = max(8, int((vmem_budget - fixed) // per_row))
    if L <= max_rows:
        return L

    # Largest divisor of L that fits; prefer 128- / 32- / 8-aligned tiles.
    for align in (128, 32, 8, 1):
        t = (max_rows // align) * align
        while t >= align:
            if L % t == 0:
                return t
            t -= align
    return L  # unreachable (align=1 always finds a divisor), kept for safety


# --------------------------------------------------------------------------- #
# Wrapper
# --------------------------------------------------------------------------- #
def scaled_dot_product_attention(q, k, v, scale, mask=None):
    """q, k, v: (B, H, L, d_k). mask: broadcastable to (B, H, L, L) or None."""
    B, H, L, d_k = q.shape
    inv_scale = 1.0 / float(scale)
    in_bytes = jnp.dtype(q.dtype).itemsize
    attn_bytes = in_bytes
    has_mask = mask is not None

    cap = _vmem_capacity_bytes()
    vmem_limit = int(cap * 0.90)          # raise scoped VMEM toward physical
    tile_budget = int(cap * 0.70)         # headroom for Mosaic internal scratch

    tq = _pick_q_tile(L, d_k, in_bytes, attn_bytes, has_mask, tile_budget)
    nq = L // tq

    # Pre-transpose K so the MXU sees a native (d_k, L) RHS and the resident K
    # tile is lane-dense (no 128-lane padding of d_k inside VMEM).
    kT = jnp.swapaxes(k, 2, 3)            # (B, H, d_k, L)

    out_shape = (
        jax.ShapeDtypeStruct((B, H, L, d_k), q.dtype),
        jax.ShapeDtypeStruct((B, H, L, L), q.dtype),
    )
    compiler_params = pltpu.CompilerParams(
        dimension_semantics=("parallel", "parallel", "parallel"),
        vmem_limit_bytes=vmem_limit,
    )

    if not has_mask:
        # No-mask path: zero extra HBM traffic for the mask.
        # grid = (B, H, nq): q-tile innermost so K/V blocks stay resident.
        grid = (B, H, nq)
        q_spec = pl.BlockSpec((None, None, tq, d_k), lambda b, h, i: (b, h, i, 0))
        k_spec = pl.BlockSpec((None, None, d_k, L), lambda b, h, i: (b, h, 0, 0))
        v_spec = pl.BlockSpec((None, None, L, d_k), lambda b, h, i: (b, h, 0, 0))
        out_spec = pl.BlockSpec((None, None, tq, d_k), lambda b, h, i: (b, h, i, 0))
        attn_spec = pl.BlockSpec((None, None, tq, L), lambda b, h, i: (b, h, i, 0))

        kernel = functools.partial(_sdpa_kernel_nomask, inv_scale=inv_scale)
        return pl.pallas_call(
            kernel,
            out_shape=out_shape,
            grid_spec=pltpu.PrefetchScalarGridSpec(
                num_scalar_prefetch=0,
                grid=grid,
                in_specs=[q_spec, k_spec, v_spec],
                out_specs=(out_spec, attn_spec),
            ),
            compiler_params=compiler_params,
        )(q, kT, v)

    # Masked path: compact int8 keep-flag, not broadcast over batch/heads when
    # the original mask doesn't carry those dims.
    m = jnp.asarray(mask)
    m = m.reshape((1,) * (4 - m.ndim) + m.shape)
    Bm = B if m.shape[0] == B else 1
    Hm = H if m.shape[1] == H else 1
    keep = (m != 0).astype(jnp.int8)
    keep = jnp.broadcast_to(keep, (Bm, Hm, L, L))
    kb = (lambda b: b) if Bm == B else (lambda b: 0)

    if Hm == 1:
        # Head-broadcast mask: make H the innermost grid axis so the (Tq, L)
        # keep block index is constant across consecutive steps -> no re-DMA.
        grid = (B, nq, H)
        q_spec = pl.BlockSpec((None, None, tq, d_k), lambda b, i, h: (b, h, i, 0))
        k_spec = pl.BlockSpec((None, None, d_k, L), lambda b, i, h: (b, h, 0, 0))
        v_spec = pl.BlockSpec((None, None, L, d_k), lambda b, i, h: (b, h, 0, 0))
        out_spec = pl.BlockSpec((None, None, tq, d_k), lambda b, i, h: (b, h, i, 0))
        attn_spec = pl.BlockSpec((None, None, tq, L), lambda b, i, h: (b, h, i, 0))
        keep_spec = pl.BlockSpec((None, None, tq, L), lambda b, i, h: (kb(b), 0, i, 0))
    else:
        # Per-head mask: keep q-tile innermost so K/V blocks stay resident.
        grid = (B, H, nq)
        q_spec = pl.BlockSpec((None, None, tq, d_k), lambda b, h, i: (b, h, i, 0))
        k_spec = pl.BlockSpec((None, None, d_k, L), lambda b, h, i: (b, h, 0, 0))
        v_spec = pl.BlockSpec((None, None, L, d_k), lambda b, h, i: (b, h, 0, 0))
        out_spec = pl.BlockSpec((None, None, tq, d_k), lambda b, h, i: (b, h, i, 0))
        attn_spec = pl.BlockSpec((None, None, tq, L), lambda b, h, i: (b, h, i, 0))
        keep_spec = pl.BlockSpec((None, None, tq, L), lambda b, h, i: (kb(b), h, i, 0))

    kernel = functools.partial(_sdpa_kernel_mask, inv_scale=inv_scale)
    return pl.pallas_call(
        kernel,
        out_shape=out_shape,
        grid_spec=pltpu.PrefetchScalarGridSpec(
            num_scalar_prefetch=0,
            grid=grid,
            in_specs=[q_spec, k_spec, v_spec, keep_spec],
            out_specs=(out_spec, attn_spec),
        ),
        compiler_params=compiler_params,
    )(q, kT, v, keep)


# --------------------------------------------------------------------------- #
# Reference + test
# --------------------------------------------------------------------------- #
def _reference(q, k, v, scale, mask=None):
    scores = jnp.einsum(
        "bhld,bhmd->bhlm", q.astype(jnp.float32), k.astype(jnp.float32)
    ) / scale
    if mask is not None:
        scores = jnp.where(mask == 0, -1000000000.0, scores)
    attn = jax.nn.softmax(scores, axis=-1)
    out = jnp.einsum("bhlm,bhmd->bhld", attn, v.astype(jnp.float32))
    return out.astype(q.dtype), attn.astype(q.dtype)


if __name__ == "__main__":
    B, H, L, d_k = 2, 4, 8, 32
    scale = d_k ** 0.5

    key = jax.random.PRNGKey(0)
    kq, kk, kv, km = jax.random.split(key, 4)
    q = jax.random.normal(kq, (B, H, L, d_k), dtype=jnp.float32)
    k = jax.random.normal(kk, (B, H, L, d_k), dtype=jnp.float32)
    v = jax.random.normal(kv, (B, H, L, d_k), dtype=jnp.float32)

    # 1) (B, 1, L, L) binary mask broadcast over heads (head-innermost grid path).
    mask = (jax.random.uniform(km, (B, 1, L, L)) > 0.2).astype(jnp.float32)
    out, attn = scaled_dot_product_attention(q, k, v, scale, mask=mask)
    out = jax.block_until_ready(out)
    attn = jax.block_until_ready(attn)
    out_ref, attn_ref = _reference(q, k, v, scale, mask=mask)
    assert jnp.allclose(out, out_ref, atol=2e-5, rtol=2e-5), "output mismatch"
    assert jnp.allclose(attn, attn_ref, atol=2e-5, rtol=2e-5), "attention mismatch"

    # 2) Full per-head (B, H, L, L) mask (q-tile-innermost grid path).
    mask_h = (jax.random.uniform(km, (B, H, L, L)) > 0.2).astype(jnp.float32)
    out_h, attn_h = scaled_dot_product_attention(q, k, v, scale, mask=mask_h)
    jax.block_until_ready(out_h)
    out_h_ref, attn_h_ref = _reference(q, k, v, scale, mask=mask_h)
    assert jnp.allclose(out_h, out_h_ref, atol=2e-5, rtol=2e-5), "output mismatch (per-head mask)"
    assert jnp.allclose(attn_h, attn_h_ref, atol=2e-5, rtol=2e-5), "attention mismatch (per-head mask)"

    # 3) mask=None path (separate kernel variant: no mask tensor built or DMAed).
    out2, attn2 = scaled_dot_product_attention(q, k, v, scale, mask=None)
    jax.block_until_ready(out2)
    out2_ref, attn2_ref = _reference(q, k, v, scale, mask=None)
    assert jnp.allclose(out2, out2_ref, atol=2e-5, rtol=2e-5), "output mismatch (no mask)"
    assert jnp.allclose(attn2, attn2_ref, atol=2e-5, rtol=2e-5), "attention mismatch (no mask)"

    print("KERNEL_OK")
</pallas_src>

<mosaic_0001>
module attributes {stable_mosaic.version = 11 : i64} {
  func.func @_sdpa_kernel_mask(%arg0: i32, %arg1: i32, %arg2: i32, %arg3: memref<1x1x8x32xf32, #tpu.memory_space<vmem>>, %arg4: memref<1x1x32x8xf32, #tpu.memory_space<vmem>>, %arg5: memref<1x1x8x32xf32, #tpu.memory_space<vmem>>, %arg6: memref<1x1x8x8xi8, #tpu.memory_space<vmem>>, %arg7: memref<1x1x8x32xf32, #tpu.memory_space<vmem>>, %arg8: memref<1x1x8x8xf32, #tpu.memory_space<vmem>>) attributes {dimension_semantics = [#tpu.dimension_semantics<parallel>, #tpu.dimension_semantics<parallel>, #tpu.dimension_semantics<parallel>], iteration_bounds = array<i64: 2, 1, 4>, scalar_prefetch = 0 : i64, scratch_operands = 0 : i64, tpu.core_type = #tpu.core_type<tc>, window_params = [{transform_indices = @transform_0, window_bounds = array<i64: 1, 1, 8, 32>}, {transform_indices = @transform_1, window_bounds = array<i64: 1, 1, 32, 8>}, {transform_indices = @transform_2, window_bounds = array<i64: 1, 1, 8, 32>}, {transform_indices = @transform_3, window_bounds = array<i64: 1, 1, 8, 8>}, {transform_indices = @transform_4, window_bounds = array<i64: 1, 1, 8, 32>}, {transform_indices = @transform_5, window_bounds = array<i64: 1, 1, 8, 8>}]} {
    %c0 = arith.constant 0 : index
    %c0_0 = arith.constant 0 : index
    %c0_1 = arith.constant 0 : index
    %c0_2 = arith.constant 0 : index
    %0 = vector.load %arg3[%c0, %c0_0, %c0_1, %c0_2] : memref<1x1x8x32xf32, #tpu.memory_space<vmem>>, vector<1x1x8x32xf32>
    %1 = vector.shape_cast %0 : vector<1x1x8x32xf32> to vector<8x32xf32>
    %c0_3 = arith.constant 0 : index
    %c0_4 = arith.constant 0 : index
    %c0_5 = arith.constant 0 : index
    %c0_6 = arith.constant 0 : index
    %2 = vector.load %arg4[%c0_3, %c0_4, %c0_5, %c0_6] : memref<1x1x32x8xf32, #tpu.memory_space<vmem>>, vector<1x1x32x8xf32>
    %3 = vector.shape_cast %2 : vector<1x1x32x8xf32> to vector<32x8xf32>
    %c0_7 = arith.constant 0 : index
    %c0_8 = arith.constant 0 : index
    %c0_9 = arith.constant 0 : index
    %c0_10 = arith.constant 0 : index
    %4 = vector.load %arg5[%c0_7, %c0_8, %c0_9, %c0_10] : memref<1x1x8x32xf32, #tpu.memory_space<vmem>>, vector<1x1x8x32xf32>
    %5 = vector.shape_cast %4 : vector<1x1x8x32xf32> to vector<8x32xf32>
    %cst = arith.constant dense<0.000000e+00> : vector<8x8xf32>
    %6 = tpu.matmul %1, %3, %cst {dimension_numbers = #tpu.dot_dimension_numbers<[1], [0], [0], [1], [0, 0, 1, 1], [], []>} : vector<8x32xf32>, vector<32x8xf32>, vector<8x8xf32> -> vector<8x8xf32>
    %cst_11 = arith.constant 0.176776692 : f32
    %7 = vector.broadcast %cst_11 : f32 to vector<8x8xf32>
    %8 = arith.mulf %6, %7 : vector<8x8xf32>
    %c0_12 = arith.constant 0 : index
    %c0_13 = arith.constant 0 : index
    %c0_14 = arith.constant 0 : index
    %c0_15 = arith.constant 0 : index
    %9 = vector.load %arg6[%c0_12, %c0_13, %c0_14, %c0_15] : memref<1x1x8x8xi8, #tpu.memory_space<vmem>>, vector<1x1x8x8xi8>
    %10 = vector.shape_cast %9 : vector<1x1x8x8xi8> to vector<8x8xi8>
    %c0_i8 = arith.constant 0 : i8
    %11 = vector.broadcast %c0_i8 : i8 to vector<8x8xi8>
    %12 = arith.cmpi ne, %10, %11 : vector<8x8xi8>
    %cst_16 = arith.constant -1.000000e+09 : f32
    %13 = vector.broadcast %cst_16 : f32 to vector<8x8xf32>
    %14 = arith.select %12, %8, %13 : vector<8x8xi1>, vector<8x8xf32>
    %cst_17 = arith.constant dense<0xFF800000> : vector<8xf32>
    %15 = vector.multi_reduction <maximumf>, %14, %cst_17 [1] : vector<8x8xf32> to vector<8xf32>
    %16 = vector.shape_cast %15 : vector<8xf32> to vector<8x1xf32>
    %17 = vector.broadcast %16 : vector<8x1xf32> to vector<8x8xf32>
    %18 = arith.subf %14, %17 : vector<8x8xf32>
    %19 = math.exp %18 : vector<8x8xf32>
    %cst_18 = arith.constant dense<0.000000e+00> : vector<8xf32>
    %20 = vector.multi_reduction <add>, %19, %cst_18 [1] : vector<8x8xf32> to vector<8xf32>
    %21 = vector.shape_cast %20 : vector<8xf32> to vector<8x1xf32>
    %22 = tpu.reciprocal %21 : vector<8x1xf32> -> vector<8x1xf32>
    %23 = vector.broadcast %22 : vector<8x1xf32> to vector<8x8xf32>
    %24 = arith.mulf %19, %23 : vector<8x8xf32>
    %cst_19 = arith.constant dense<0.000000e+00> : vector<8x32xf32>
    %25 = tpu.matmul %24, %5, %cst_19 {dimension_numbers = #tpu.dot_dimension_numbers<[1], [0], [0], [1], [0, 0, 1, 1], [], []>} : vector<8x8xf32>, vector<8x32xf32>, vector<8x32xf32> -> vector<8x32xf32>
    %c0_20 = arith.constant 0 : index
    %c0_21 = arith.constant 0 : index
    %c0_22 = arith.constant 0 : index
    %c0_23 = arith.constant 0 : index
    %26 = vector.load %arg7[%c0_20, %c0_21, %c0_22, %c0_23] : memref<1x1x8x32xf32, #tpu.memory_space<vmem>>, vector<1x1x8x32xf32>
    %27 = vector.shape_cast %26 : vector<1x1x8x32xf32> to vector<8x32xf32>
    %28 = vector.shape_cast %25 : vector<8x32xf32> to vector<1x1x8x32xf32>
    tpu.vector_store %arg7[%c0_20, %c0_21, %c0_22, %c0_23], %28 {strides = array<i32>} : memref<1x1x8x32xf32, #tpu.memory_space<vmem>>, vector<1x1x8x32xf32>,
    %c0_24 = arith.constant 0 : index
    %c0_25 = arith.constant 0 : index
    %c0_26 = arith.constant 0 : index
    %c0_27 = arith.constant 0 : index
    %29 = vector.load %arg8[%c0_24, %c0_25, %c0_26, %c0_27] : memref<1x1x8x8xf32, #tpu.memory_space<vmem>>, vector<1x1x8x8xf32>
    %30 = vector.shape_cast %29 : vector<1x1x8x8xf32> to vector<8x8xf32>
    %31 = vector.shape_cast %24 : vector<8x8xf32> to vector<1x1x8x8xf32>
    tpu.vector_store %arg8[%c0_24, %c0_25, %c0_26, %c0_27], %31 {strides = array<i32>} : memref<1x1x8x8xf32, #tpu.memory_space<vmem>>, vector<1x1x8x8xf32>,
    return
  }
  func.func @transform_0(%arg0: i32, %arg1: i32, %arg2: i32) -> (i32, i32, i32, i32) {
    %c0_i32 = arith.constant 0 : i32
    %c0_i32_0 = arith.constant 0 : i32
    return %arg0, %arg2, %arg1, %c0_i32 : i32, i32, i32, i32
  }
  func.func @transform_1(%arg0: i32, %arg1: i32, %arg2: i32) -> (i32, i32, i32, i32) {
    %c0_i32 = arith.constant 0 : i32
    %c0_i32_0 = arith.constant 0 : i32
    %c0_i32_1 = arith.constant 0 : i32
    return %arg0, %arg2, %c0_i32, %c0_i32_0 : i32, i32, i32, i32
  }
  func.func @transform_2(%arg0: i32, %arg1: i32, %arg2: i32) -> (i32, i32, i32, i32) {
    %c0_i32 = arith.constant 0 : i32
    %c0_i32_0 = arith.constant 0 : i32
    %c0_i32_1 = arith.constant 0 : i32
    return %arg0, %arg2, %c0_i32, %c0_i32_0 : i32, i32, i32, i32
  }
  func.func @transform_3(%arg0: i32, %arg1: i32, %arg2: i32) -> (i32, i32, i32, i32) {
    %c0_i32 = arith.constant 0 : i32
    %c0_i32_0 = arith.constant 0 : i32
    %c0_i32_1 = arith.constant 0 : i32
    return %arg0, %c0_i32, %arg1, %c0_i32_0 : i32, i32, i32, i32
  }
  func.func @transform_4(%arg0: i32, %arg1: i32, %arg2: i32) -> (i32, i32, i32, i32) {
    %c0_i32 = arith.constant 0 : i32
    %c0_i32_0 = arith.constant 0 : i32
    return %arg0, %arg2, %arg1, %c0_i32 : i32, i32, i32, i32
  }
  func.func @transform_5(%arg0: i32, %arg1: i32, %arg2: i32) -> (i32, i32, i32, i32) {
    %c0_i32 = arith.constant 0 : i32
    %c0_i32_0 = arith.constant 0 : i32
    return %arg0, %arg2, %arg1, %c0_i32 : i32, i32, i32, i32
  }
}

</mosaic_0001>

<bundles_post_ra>
// kernel: tpu_custom_call.1
= control target key start
LH: loop header
LB: loop body
LE: loop exit
PB: predicated region body
PF: predicated region fallthrough
CT: control target
= control target key end

     0   :  { %11 = vsyncpa [#allocation3], 0  ;;  %s1115_s0 = inlined_call_operand.vmem [shape: f32[2,4,8,32], index: 0, kind: input, shape index: {}]   ;;  %s1116_s1 = inlined_call_operand.vmem [shape: f32[2,4,32,8], index: 1, kind: input, shape index: {}]   ;;  %s1117_s2 = inlined_call_operand.vmem [shape: f32[2,4,8,32], index: 2, kind: input, shape index: {}]   ;;  %s1118_s3 = inlined_call_operand.vmem [shape: s8[2,1,8,8], index: 3, kind: input, shape index: {}]   ;;  %s1119_s4 = inlined_call_operand.hbm [shape: f32[2,4,8,32], index: 4, kind: output, shape index: {0}]   ;;  %s1120_s5 = inlined_call_operand.hbm [shape: f32[2,4,8,8], index: 5, kind: output, shape index: {1}]  }
   0x1   :  { %13 = vsyncpa [#allocation3 + $0x1], 0 }
   0x2   :  { %14 = vsyncpa [#allocation5], 0 }
   0x3   :  { %16 = vsyncpa [#allocation5 + $0x1], 0  ;;  %s946_s18 = smov 0   ;;  %s948_s19 = smov 0  }
   0x4   :  { %s950_s20 = smov 0   ;;  %s952_s21 = smov 0  }
   0x5   :  { %s954_s22 = smov 0   ;;  %s956_s23 = smov 0  }
   0x6   :  { %s958_s24 = smov 0   ;;  %s960_s25 = smov 0  }
   0x7 LB: > { %1124 = sst [smem:[#allocation8_spill]] %s909_s24  ;;  %s681_s26 = sadd.s32 4294967295, %s913_s25   ;;  %s913_s25 = sphi %s960_s25, %s22_s25   ;;  %s909_s24 = sphi %s958_s24, %s1131_s24   ;;  %s905_s23 = sphi %s956_s23, %s1136_s23   ;;  %s901_s22 = sphi %s954_s22, %s1129_s22   ;;  %s897_s21 = sphi %s952_s21, %s1135_s21   ;;  %s893_s20 = sphi %s950_s20, %s1134_s20   ;;  %s889_s19 = sphi %s948_s19, %s1133_s19   ;;  %s885_s18 = sphi %s946_s18, %s1132_s18  }
   0x8   : > { %s682_s27 = sadd.s32 4294967294, %s913_s25   ;;  %s34_s28 = sadd.s32 1, %s905_s23 }
   0x9   : > { %p35_p0 = scmp.ge.s32.totalorder %s34_s28, 4  ;;  %s41_s29 = sadd.s32 1, %s909_s24 }
   0xa   : > { %p176_p1 = scmp.ne.s32.totalorder %s893_s20, %s889_s19  ;;  %p177_p2 = scmp.eq.s32.totalorder %s681_s26, 7 }
   0xb   : > { %s1138_s28 = smov (%p35_p0, %s34_s28), 0  ;;  %s1140_s29 = smov (!%p35_p0, %s41_s29), %s909_s24 }
   0xc   : > { %1125 = sst [smem:[#allocation9_spill]] %s1138_s28  ;;  %s160_s30 = ssub.s32 %s905_s23, %s1138_s28 }
   0xd   : > { %p997_p3 = por %p177_p2, %p176_p1  ;;  %p43_p4 = scmp.ge.s32.totalorder %s1140_s29, 2 }
   0xe   : > { %p182_p5 = scmp.ne.s32.totalorder %s889_s19, %s885_s18  ;;  %p183_p6 = scmp.eq.s32.totalorder %s682_s27, 7 }
   0xf   : > { %p685_p7 = scmp.ge.s32.totalorder %s913_s25, 1  ;;  %s1142_s29 = smov (%p43_p4, %s1140_s29), 0 }
  0x10   : > { %1127 = sst [smem:[#allocation10_spill]] %s1142_s29  ;;  %p1006_p8 = por %p183_p6, %p182_p5 }
  0x11   : > { %p278_p9 = scmp.lt.s32.totalorder %s913_s25, 9  ;;  %s159_s8 = ssub.s32 %s909_s24, %s1142_s29 }
  0x12   : > { %s166_s9 = sadd.s32 1, %s893_s20  ;;  %s161_s10 = sor.u32 %s160_s30, %s159_s8 }
  0x13   : > { %p279_p10 = pnand %p685_p7, %p278_p9  ;;  %p164_p11 = scmp.eq.s32.totalorder %s161_s10, 0 }
  0x14   : > { %p341_p12 = scmp.lt.s32.totalorder (!%p279_p10), %s901_s22, 1  ;;  %p343_p13 = scmp.lt.s32.totalorder (!%p279_p10), %s897_s21, 3 }
  0x15   : > { %s1015_s11 = scalar_select %p164_p11, %s893_s20, %s166_s9  }
  0x16   : > { %282 = sbr.rel (%p279_p10) target bundleno = 564 (0x234), region = 36 }
  0x1b   : > { %s342_s12 = scalar_select %p341_p12, %s901_s22, 1  ;;  %vm384_vm0 = vcmask 261120   ;;  %v915_v6 = vmov 0   ;;  %vm415_vm3 = vcmask 64512  }
  0x1c   : > { %s344_s13 = scalar_select %p343_p13, %s897_s21, 3 }
  0x1d   : > { %s691_s14 = sshll.u32 %s342_s12, 4  ;;  %s688_s15 = sshll.u32 %s342_s12, 2 }
  0x1e   : > { %s690_s16 = sshll.u32 %s344_s13, 2  ;;  %s1021_s17 = sadd.s32 %s688_s15, %s344_s13 }
  0x1f   : > { %s358_s26 = sadd.s32 %s691_s14, %s690_s16  ;;  %s689_s10 = sshll.u32 %s1021_s17, 3 }
  0x20   : > { %s692_s27 = sshll.u32 %s358_s26, 3  ;;  %s351_s24 = scalar_lea.vmem %s1115_s0, %s689_s10 }
  0x21   : > { %s360_s9 = scalar_lea.vmem %s1116_s1, %s692_s27  ;;  %v378_v4 = vld [vmem:[%s351_s24] sm:$0xff]  ;;  %s695_s13 = sshll.u32 %s342_s12, 1 }
  0x22   : > { %v382_v0 = vld [vmem:[%s360_s9 + $0x18] sm:$0xff]  ;;  %v381_v1 = vld [vmem:[%s360_s9 + $0x10] sm:$0xff]  ;;  %v380_v2 = vld [vmem:[%s360_s9 + $0x8] sm:$0xff]  ;;  %s375_s16 = scalar_lea.vmem %s1118_s3, %s695_s13  ;;  %s368_s29 = scalar_lea.vmem %s1117_s2, %s689_s10 }
  0x23   : > { %400 = vmatpush.msra.mxu0 %v382_v0  ;;  %v379_v3 = vld [vmem:[%s360_s9] sm:$0xff]  ;;  %s1044_s12 = sand.u32 1, %s889_s19   ;;  %s700_s17 = sshll.u32 %s901_s22, 2 }
  0x24   : > { %v409_v5 = vld [vmem:[%s375_s16] sm:$0x3]  ;;  %s686_s26 = sshll.u32 %s1044_s12, 3  ;;  %s1049_s27 = sadd.s32 %s897_s21, %s700_s17 }
  0x25   : > { %401 = vmatpush.msra.mxu0 %v381_v1  ;;  %vm410_vm1 = vnez %v409_v5  ;;  %v383_v18 = vld [vmem:[%s368_s29] sm:$0xff]  ;;  %s701_s30 = sshll.u32 %s1049_s27, 3  ;;  %s340_s22 = scalar_lea.vmem [#allocation4], %s686_s26 }
  0x26   : > { %v411_v7 = vsel %vm410_vm1, 16843009, %v915_v6  ;;  %458 = vmatpush.msra.mxu1 %v383_v18  ;;  %s501_s10 = scalar_lea.hbm %s1120_s5, %s701_s30  ;;  %s503_s21 = sshll.u32 %s340_s22, 4  ;;  %s504_s21 = int_to_ptr.vmem [resolvable:$true] %s503_s21 }
  0x27   : > { %402 = vmatpush.msra.mxu0 %v380_v2  ;;  %v412_v8 = vunpack.c.0.s8 %v411_v7  ;;  %s505_s13 = sshll.u32 %s501_s10, 4  ;;  %s471_s14 = scalar_lea.sflag [#allocation5], %s1044_s12  ;;  %s506_s13 = int_to_ptr.hbm [resolvable:$true] %s505_s13 }
  0x28   : > { %s801_s15 = sshra.s32 %s506_s13, 4  ;;  %s807_s29 = scalar_lea.hbm %s1120_s5, 64  ;;  %s802_s15 = int_to_ptr.hbm [resolvable:$true] %s801_s15 }
  0x29   : > { %403 = vmatpush.msra.mxu0 %v379_v3  ;;  %vm413_vm2 = vcmp.ne.s32.totalorder %v412_v8, 0  ;;  %s803_s16 = scalar_lea.hbm %s802_s15, 8  ;;  %p808_p4 = scmp.lt.s32.totalorder %s802_s15, %s1120_s5 }
  0x2a   : > { %696 = vmatmul.msk.f32.vlgmr.msra.gmra.mxu0 %vm384_vm0, %v378_v4  ;;  %p804_p0 = scmp.ne.s32.totalorder %s802_s15, %s803_s16  ;;  %p809_p5 = scmp.lt.s32.totalorder %s807_s29, %s803_s16 }
  0x2c   : > { %p805_p1 = pnand %p804_p0, %p997_p3  ;;  %p810_p6 = por %p809_p5, %p808_p4 }
  0x2e   : > { %p806_p2 = pneg %p805_p1 }
  0x30   : > { %p811_p7 = pnand %p810_p6, %p806_p2 }
  0xa7   : > { %v405_v9 = vpop.f32.mrf.mxu0 }
  0xa8   : > { %v408_v10 = vmul.f32 0.17677669, %v405_v9 }
  0xaa   : > { %v414_v11 = vsel %vm413_vm2, %v408_v10, -1e+09 }
  0xab   : > { %v416_v12 = vsel %vm415_vm3, %v414_v11, -inf }
  0xac   : > { %417 = vmax.xlane.f32.xlu0 %v416_v12 }
 0x11f   : > { %v418_v13 = vpop.xlane.xlu0 %417 }
 0x120   : > { %v419_v14 = vsub.f32 %v414_v11, %v418_v13 }
 0x122   : > { %v420_v15 = vmul.f32 1.442695, %v419_v14 }
 0x124   : > { %783 = vpow2.f32 %v420_v15 }
 0x12a   : > { %v784_v16 = vpop.eup %783 }
 0x12b   : > { %v422_v17 = vsel %vm415_vm3, %v784_v16, 0.0 }
 0x12c   : > { %423 = vadd.xlane.f32.xlu0 %v422_v17 }
 0x19f   : > { %v424_v19 = vpop.xlane.xlu0 %423 }
 0x1a0   : > { %785 = vrcp.f32 %v424_v19  ;;  %v436_v23 = vand.u32 2147483648, %v424_v19  ;;  %v434_v25 = vand.u32 2147483647, %v424_v19  ;;  %vm430_vm5 = vweird.f32 %v424_v19 }
 0x1a2   : > { %v437_v27 = vor.u32 1.1754944e-38, %v436_v23  ;;  %vm435_vm7 = vcmp.eq.f32.partialorder %v434_v25, 8.507059e+37 }
 0x1a6   : > { %v786_v20 = vpop.eup %785 }
 0x1a7   : > { %v426_v21 = vmul.f32 %v786_v20, %v424_v19  ;;  %vm431_vm4 = vweird.f32 %v786_v20 }
 0x1a8   : > { %vm432_vm6 = vmor %vm430_vm5, %vm431_vm4 }
 0x1a9   : > { %v427_v22 = vsub.f32 1.0, %v426_v21 }
 0x1ab   : > { %v428_v24 = vmul.f32 %v786_v20, %v427_v22 }
 0x1ad   : > { %v429_v26 = vadd.f32 %v786_v20, %v428_v24 }
 0x1af   : > { %v433_v28 = vsel %vm432_vm6, %v786_v20, %v429_v26 }
 0x1b0   : > { %v438_v29 = vsel %vm435_vm7, %v437_v27, %v433_v28 }
 0x1b1   : > { %v439_v30 = vmul.f32 %v784_v16, %v438_v29 }
 0x1b3   : > { %697 = vmatmul.msk.f32.vlgmr.msra.gmra.mxu1 %vm415_vm3, %v439_v30  ;;  %464 = vst.msk [vmem:[%s340_s22] sm:$0xff] %vm415_vm3, %v439_v30 }
 0x1b4   : > { %814 = shalt.err (!%p811_p7)
}
 0x1b5   : > { %707 = dma.vmem_to_hbm [thread:$0]  (%p997_p3), %s504_s21, 128, %s506_s13, %s471_s14  }
 0x1b6   : > { %s484_s10 = scalar_lea.hbm %s1119_s4, %s701_s30  ;;  %s333_s22 = scalar_lea.vmem [#allocation2], %s686_s26 }
 0x1b7   : > { %s486_s24 = sshll.u32 %s333_s22, 4  ;;  %s488_s28 = sshll.u32 %s484_s10, 4  ;;  %s487_s24 = int_to_ptr.vmem [resolvable:$true] %s486_s24  ;;  %s489_s28 = int_to_ptr.hbm [resolvable:$true] %s488_s28 }
 0x1b8   : > { %s466_s15 = scalar_lea.sflag [#allocation3], %s1044_s12  ;;  %s829_s16 = sshra.s32 %s489_s28, 4  ;;  %s830_s16 = int_to_ptr.hbm [resolvable:$true] %s829_s16 }
 0x1b9   : > { %s831_s29 = scalar_lea.hbm %s830_s16, 8  ;;  %s835_s30 = scalar_lea.hbm %s1119_s4, 64 }
 0x1ba   : > { %p832_p9 = scmp.ne.s32.totalorder %s830_s16, %s831_s29  ;;  %p836_p12 = scmp.lt.s32.totalorder %s830_s16, %s1119_s4 }
 0x1bb   : > { %p837_p13 = scmp.lt.s32.totalorder %s835_s30, %s831_s29 }
 0x1bc   : > { %p833_p10 = pnand %p832_p9, %p997_p3 }
 0x1bd   : > { %p838_p0 = por %p837_p13, %p836_p12 }
 0x1be   : > { %p834_p11 = pneg %p833_p10 }
 0x1c0   : > { %p839_p1 = pnand %p838_p0, %p834_p11 }
 0x230   : > { %v460_v31 = vpop.f32.mrf.mxu1 }
 0x231   : > { %463 = vst.msk [vmem:[%s333_s22] sm:$0xff] %vm384_vm0, %v460_v31 }
 0x232   : > { %842 = shalt.err (!%p839_p1)
}
 0x233   : > { %706 = dma.vmem_to_hbm [thread:$0]  (%p997_p3), %s487_s24, 128, %s489_s28, %s466_s15  }
 0x234 PF: > { %p717_p2 = scmp.ge.s32.totalorder %s913_s25, 2  ;;  %s517_s12 = sand.u32 1, %s885_s18  }
 0x235   : > { %s518_s17 = scalar_lea.sflag [#allocation3], %s517_s12 }
 0x236   : > { %p711_p4 = pnand %p717_p2, %p1006_p8 }
 0x238   : > { %p712_p5 = pneg %p711_p4 }
 0x23a   : > { %876 = dma.done.wait (%p712_p5), %s518_s17, 128  }
 0x23b   : > { %878 = vsyncadd (%p712_p5), %s518_s17, 4294967168  ;;  %s528_s27 = scalar_lea.sflag [#allocation5], %s517_s12 }
 0x23c   : > { %880 = dma.done.wait (%p712_p5), %s528_s27, 128  }
 0x23d   : > { %882 = vsyncadd (%p712_p5), %s528_s27, 4294967168  ;;  %s22_s25 = sadd.s32 1, %s913_s25   ;;  %s1129_s22 = sld [smem:[#allocation8_spill]] }
 0x23e   : > { %p19_p6 = scmp.ge.s32.totalorder %s22_s25, 10   ;;  %s1130_s6 = sld [smem:[#allocation9_spill]] }
 0x23f   : > { %s1131_s24 = sld [smem:[#allocation10_spill]]  ;;  %s1132_s18 = smov %s889_s19 }
 0x240   : > { %s1133_s19 = smov %s893_s20  ;;  %s1134_s20 = smov %s1015_s11 }
 0x241   : > { %s1135_s21 = smov %s905_s23  ;;  %21 = sbr.rel (!%p19_p6) target bundleno = 7 (0x7), region = 97 }
 0x244   : > { %s1136_s23 = smov %s1130_s6 }
 0x246   :  { %534 = vsyncpa [#allocation3], 1 }
 0x247   :  { %536 = vsyncpa [#allocation3 + $0x1], 1 }
 0x248   :  { %537 = vsyncpa [#allocation5], 1 }
 0x249   :  { %539 = vsyncpa [#allocation5 + $0x1], 1 }

</bundles_post_ra>
